<compile_context>
chip_gen: v5e
topology: v5e:2x2
jax: 0.10.0
libtpu: 0.0.40
codegen_flags: <defaults>
</compile_context>

<pallas_src>
import functools

import jax
import jax.numpy as jnp
from jax.experimental import pallas as pl
from jax.experimental.pallas import tpu as pltpu


def _round_up(x, m):
    return ((x + m - 1) // m) * m


# ---------------------------------------------------------------------------
# Kernel 1: one direction of the CLIP contrastive loss
#   rows = "query" features, cols = "key" features;
#   emits per-row-block sum_i (logsumexp_j(scale * <r_i, c_j>) - scale * <r_i, c_i>)
# ---------------------------------------------------------------------------
def _clip_row_ce_kernel(scale_ref, a_ref, b_ref, out_ref, m_r, l_r, d_r, *, batch):
    i = pl.program_id(0)
    j = pl.program_id(1)
    n_j = pl.num_programs(1)
    tb = a_ref.shape[0]

    @pl.when(j == 0)
    def _():
        m_r[...] = jnp.full_like(m_r, -jnp.inf)
        l_r[...] = jnp.zeros_like(l_r)
        d_r[...] = jnp.zeros_like(d_r)

    # (tb, tb) similarity tile on the MXU in the features' native dtype, f32 accumulate,
    # contraction on the feature axis (no explicit transpose).
    s = jax.lax.dot_general(
        a_ref[...], b_ref[...],
        dimension_numbers=(((1,), (1,)), ((), ())),
        preferred_element_type=jnp.float32)
    # Scale the f32 tile post-matmul: keeps logit_scale in f32 and avoids re-scaling the
    # (tb, D) operand on every inner step.
    s = s * scale_ref[0]

    row_ids = jax.lax.broadcasted_iota(jnp.int32, (tb, 1), 0) + i * tb
    col_ids = jax.lax.broadcasted_iota(jnp.int32, (1, tb), 1) + j * tb
    row_valid = row_ids < batch
    s = jnp.where(row_valid & (col_ids < batch), s, jnp.float32(-1e30))

    # Diagonal (target logit) comes straight off the already-materialized f32 tile.
    @pl.when(i == j)
    def _():
        d_r[...] += jnp.sum(jnp.where(row_ids == col_ids, s, 0.0),
                            axis=1, keepdims=True)

    # Online row-wise logsumexp across column blocks.
    m_prev = m_r[...]
    m_new = jnp.maximum(m_prev, jnp.max(s, axis=1, keepdims=True))
    l_r[...] = l_r[...] * jnp.exp(m_prev - m_new) + jnp.sum(
        jnp.exp(s - m_new), axis=1, keepdims=True)
    m_r[...] = m_new

    @pl.when(j == n_j - 1)
    def _():
        lse = m_r[...] + jnp.log(l_r[...])
        total = jnp.sum(jnp.where(row_valid, lse - d_r[...], 0.0))
        # Lane-dense (1, 8, 128) partial: [0, 0, 0] = sum of per-row CE losses in this block.
        sub = jax.lax.broadcasted_iota(jnp.int32, (1, 8, 128), 1)
        lane = jax.lax.broadcasted_iota(jnp.int32, (1, 8, 128), 2)
        out_ref[...] = jnp.where((sub == 0) & (lane == 0), total, jnp.float32(0.0))


def clip_contrastive_loss(image_features, text_features, logit_scale, *, block_b=512):
    B, D = image_features.shape
    tb = min(block_b, _round_up(B, 8))
    Bp = _round_up(B, tb)
    if Bp != B:
        pad = Bp - B
        image_features = jnp.pad(image_features, ((0, pad), (0, 0)))
        text_features = jnp.pad(text_features, ((0, pad), (0, 0)))
    n_blk = Bp // tb

    scale = jnp.asarray(logit_scale, jnp.float32).reshape(1)
    kernel = functools.partial(_clip_row_ce_kernel, batch=B)

    def one_direction(rows, cols):
        out = pl.pallas_call(
            kernel,
            out_shape=jax.ShapeDtypeStruct((n_blk, 8, 128), jnp.float32),
            grid=(n_blk, n_blk),
            in_specs=[
                pl.BlockSpec(memory_space=pltpu.MemorySpace.SMEM),   # logit_scale (f32[1])
                pl.BlockSpec((tb, D), lambda i, j: (i, 0)),          # query rows
                pl.BlockSpec((tb, D), lambda i, j: (j, 0)),          # key rows (cols of S)
            ],
            out_specs=pl.BlockSpec((1, 8, 128), lambda i, j: (i, 0, 0)),
            scratch_shapes=[
                pltpu.VMEM((tb, 1), jnp.float32),   # running row max
                pltpu.VMEM((tb, 1), jnp.float32),   # running row sum(exp)
                pltpu.VMEM((tb, 1), jnp.float32),   # diagonal (target) logits
            ],
            compiler_params=pltpu.CompilerParams(
                dimension_semantics=("parallel", "arbitrary")),   # row blocks // col reduce
        )(scale, rows, cols)
        return jnp.sum(out[:, 0, 0]) / B

    # Column CE == row CE of the transposed logits: re-run with operands swapped.
    ce_img = one_direction(image_features, text_features)   # CE(scale * I @ T^T, arange(B))
    ce_txt = one_direction(text_features, image_features)   # CE(scale * T @ I^T, arange(B))
    return 0.5 * (ce_img + ce_txt)


# ---------------------------------------------------------------------------
# Kernel 2: caption token-level cross-entropy with ignore_index (pad_id)
# ---------------------------------------------------------------------------
def _caption_ce_kernel(logits_ref, labels_ref, out_ref, m_ref, l_ref, t_ref,
                       *, pad_id, vocab, n_tokens, mask_cols):
    i = pl.program_id(0)
    j = pl.program_id(1)
    n_j = pl.num_programs(1)
    tn, tv = logits_ref.shape

    @pl.when(j == 0)
    def _():
        m_ref[...] = jnp.full_like(m_ref, -jnp.inf)
        l_ref[...] = jnp.zeros_like(l_ref)
        t_ref[...] = jnp.zeros_like(t_ref)

    logits = logits_ref[...]                                  # (tn, tv) native dtype
    labels = labels_ref[...]                                  # (tn, 1) int32
    lane = jax.lax.broadcasted_iota(jnp.int32, (1, tv), 1)    # small (1, tv) lane iota

    # Target logit: each token's label lands in exactly one vocab block.
    # (select discards anything in the out-of-bounds region; keep this a select)
    tgt_hit = lane == (labels - j * tv)
    t_ref[...] += jnp.sum(jnp.where(tgt_hit, logits, 0),
                          axis=1, keepdims=True, dtype=jnp.float32)

    if mask_cols:
        # Only emitted when the vocab grid overshoots the real vocab; keeps the hot path
        # (V a multiple of tv) free of this per-element select.
        neg = jnp.asarray(jnp.finfo(logits.dtype).min, logits.dtype)
        logits = jnp.where(lane < (vocab - j * tv), logits, neg)

    # Online LSE over vocab blocks: block max in native dtype (bf16-native VPU on v6e/v7x),
    # upcast to f32 only inside the exp path.
    m_prev = m_ref[...]
    m_new = jnp.maximum(m_prev,
                        jnp.max(logits, axis=1, keepdims=True).astype(jnp.float32))
    p = jnp.exp(logits.astype(jnp.float32) - m_new)
    l_ref[...] = l_ref[...] * jnp.exp(m_prev - m_new) + jnp.sum(p, axis=1, keepdims=True)
    m_ref[...] = m_new

    @pl.when(j == n_j - 1)
    def _():
        lse = m_ref[...] + jnp.log(l_ref[...])
        row = jax.lax.broadcasted_iota(jnp.int32, (tn, 1), 0) + i * tn
        valid = (labels != pad_id) & (row < n_tokens)
        total = jnp.sum(jnp.where(valid, lse - t_ref[...], 0.0))
        count = jnp.sum(valid.astype(jnp.float32))
        # Lane-dense (1, 8, 128) partial: [0,0,0] = sum of losses, [0,0,1] = token count.
        sub = jax.lax.broadcasted_iota(jnp.int32, (1, 8, 128), 1)
        lane3 = jax.lax.broadcasted_iota(jnp.int32, (1, 8, 128), 2)
        out_ref[...] = jnp.where(
            (sub == 0) & (lane3 == 0), total,
            jnp.where((sub == 0) & (lane3 == 1), count, jnp.float32(0.0)))


def caption_cross_entropy(logits, labels, pad_id=0, *, block_tokens=None, block_vocab=4096):
    # logits: [B, T, V], labels: [B, T]  (matches F.cross_entropy(logits.permute(0,2,1), labels))
    B, T, V = logits.shape
    N = B * T
    logits2d = logits.reshape(N, V)
    labels2d = labels.astype(jnp.int32).reshape(N, 1)

    itemsize = jnp.dtype(logits2d.dtype).itemsize
    if block_tokens is None:
        # Target ~4 MiB logits tiles: amortizes per-grid-step overhead while staying inside
        # v7x's 64 MiB physical VMEM once f32 temporaries are accounted for.
        block_tokens = 512 if itemsize <= 2 else 256

    tn = min(block_tokens, _round_up(N, 8))
    tv = min(block_vocab, _round_up(V, 128))

    # Pad only when a single block would exceed the whole array (tiny inputs); larger inputs
    # rely on in-kernel select-masking of the trailing partial block (do NOT turn those
    # selects into multiply-by-mask).
    if tn > N:
        logits2d = jnp.pad(logits2d, ((0, tn - N), (0, 0)))
        labels2d = jnp.pad(labels2d, ((0, tn - N), (0, 0)), constant_values=pad_id)
    if tv > V:
        logits2d = jnp.pad(logits2d, ((0, 0), (0, tv - V)))

    n_rows, n_cols = logits2d.shape
    g_tok = pl.cdiv(n_rows, tn)
    g_voc = pl.cdiv(n_cols, tv)
    mask_cols = (g_voc * tv != V)   # static: vocab grid overshoots the real vocab

    kernel = functools.partial(_caption_ce_kernel, pad_id=pad_id, vocab=V,
                               n_tokens=N, mask_cols=mask_cols)

    # HBM-bound kernel: size the VMEM budget to the tile (2x double-buffered input tile +
    # f32 elementwise temporaries + slack). v5e's scoped default is only 16 MiB; cap at
    # v7x's 64 MiB physical VMEM.
    vmem_limit = int(2 * tn * tv * itemsize + 3 * tn * tv * 4 + (8 << 20))
    vmem_limit = max(min(vmem_limit, 64 << 20), 32 << 20)

    out = pl.pallas_call(
        kernel,
        out_shape=jax.ShapeDtypeStruct((g_tok, 8, 128), jnp.float32),
        grid=(g_tok, g_voc),
        in_specs=[
            pl.BlockSpec((tn, tv), lambda i, j: (i, j)),
            pl.BlockSpec((tn, 1), lambda i, j: (i, 0)),
        ],
        out_specs=pl.BlockSpec((1, 8, 128), lambda i, j: (i, 0, 0)),
        scratch_shapes=[
            pltpu.VMEM((tn, 1), jnp.float32),   # running max
            pltpu.VMEM((tn, 1), jnp.float32),   # running sum(exp)
            pltpu.VMEM((tn, 1), jnp.float32),   # accumulated target logit
        ],
        compiler_params=pltpu.CompilerParams(
            dimension_semantics=("parallel", "arbitrary"),   # token blocks // vocab reduce
            vmem_limit_bytes=vmem_limit),
    )(logits2d, labels2d)

    total = jnp.sum(out[:, 0, 0])
    count = jnp.sum(out[:, 0, 1])
    return total / count   # NaN iff every label == pad_id (matches torch CrossEntropyLoss)


# ---------------------------------------------------------------------------
# CoCaLoss forward (wrapper, matches the PyTorch module's forward signature)
# ---------------------------------------------------------------------------
def coca_loss(image_features, text_features, logits, labels, logit_scale,
              *, caption_loss_weight, clip_loss_weight, pad_id=0):
    if clip_loss_weight:   # static Python branch, mirrors `if self.clip_loss_weight:`
        clip_l = clip_loss_weight * clip_contrastive_loss(
            image_features, text_features, logit_scale)
    else:
        clip_l = jnp.asarray(0.0, jnp.float32)
    cap_l = caption_loss_weight * caption_cross_entropy(logits, labels, pad_id=pad_id)
    return clip_l, cap_l


if __name__ == "__main__":
    key = jax.random.PRNGKey(0)
    k_img, k_txt, k_log, k_lab = jax.random.split(key, 4)

    B, D = 8, 32       # batch, embedding dim
    T, V = 8, 128      # caption length, vocab size
    pad_id = 0
    clip_w, cap_w = 1.0, 2.0

    image_features = jax.random.normal(k_img, (B, D), jnp.float32)
    text_features = jax.random.normal(k_txt, (B, D), jnp.float32)
    cap_logits = jax.random.normal(k_log, (B, T, V), jnp.float32)
    cap_labels = jax.random.randint(k_lab, (B, T), 0, V, jnp.int32)  # labels==0 are ignored
    logit_scale = jnp.float32(2.6592)

    clip_l, cap_l = coca_loss(
        image_features, text_features, cap_logits, cap_labels, logit_scale,
        caption_loss_weight=cap_w, clip_loss_weight=clip_w, pad_id=pad_id)
    jax.block_until_ready((clip_l, cap_l))

    # --- pure-JAX reference sanity check ---
    def _log_softmax(x):
        m = jnp.max(x, axis=-1, keepdims=True)
        return x - m - jnp.log(jnp.sum(jnp.exp(x - m), axis=-1, keepdims=True))

    li = (logit_scale * image_features) @ text_features.T
    ar = jnp.arange(B)
    ref_clip = clip_w * 0.5 * (
        -jnp.mean(_log_softmax(li)[ar, ar]) + -jnp.mean(_log_softmax(li.T)[ar, ar]))
    lp = _log_softmax(cap_logits)
    nll = -jnp.take_along_axis(lp, cap_labels[..., None], axis=-1)[..., 0]
    msk = (cap_labels != pad_id).astype(jnp.float32)
    ref_cap = cap_w * jnp.sum(nll * msk) / jnp.sum(msk)

    assert jnp.allclose(clip_l, ref_clip, rtol=5e-3, atol=5e-3)
    assert jnp.allclose(cap_l, ref_cap, rtol=5e-3, atol=5e-3)

    print("KERNEL_OK")
</pallas_src>

<mosaic_0001>
module attributes {stable_mosaic.version = 11 : i64} {
  func.func @_clip_row_ce_kernel(%arg0: i32, %arg1: i32, %arg2: memref<1xf32, #tpu.memory_space<smem>>, %arg3: memref<8x32xf32, #tpu.memory_space<vmem>>, %arg4: memref<8x32xf32, #tpu.memory_space<vmem>>, %arg5: memref<1x8x128xf32, #tpu.memory_space<vmem>>, %arg6: memref<8x1xf32, #tpu.memory_space<vmem>>, %arg7: memref<8x1xf32, #tpu.memory_space<vmem>>, %arg8: memref<8x1xf32, #tpu.memory_space<vmem>>) attributes {dimension_semantics = [#tpu.dimension_semantics<parallel>, #tpu.dimension_semantics<arbitrary>], iteration_bounds = array<i64: 1, 1>, scalar_prefetch = 0 : i64, scratch_operands = 3 : i64, tpu.core_type = #tpu.core_type<tc>, window_params = [{transform_indices = @transform_0, window_bounds = array<i64: 1>}, {transform_indices = @transform_1, window_bounds = array<i64: 8, 32>}, {transform_indices = @transform_2, window_bounds = array<i64: 8, 32>}, {transform_indices = @transform_3, window_bounds = array<i64: 1, 8, 128>}]} {
    %c0_i32 = arith.constant 0 : i32
    %0 = arith.cmpi eq, %arg1, %c0_i32 : i32
    %1 = arith.extui %0 : i1 to i32
    %c0_i32_0 = arith.constant 0 : i32
    %2 = arith.cmpi ne, %1, %c0_i32_0 : i32
    scf.if %2 {
      %cst_22 = arith.constant 0xFF800000 : f32
      %48 = vector.broadcast %cst_22 : f32 to vector<8x1xf32>
      %c0_23 = arith.constant 0 : index
      %c0_24 = arith.constant 0 : index
      %49 = vector.load %arg6[%c0_23, %c0_24] : memref<8x1xf32, #tpu.memory_space<vmem>>, vector<8x1xf32>
      tpu.vector_store %arg6[%c0_23, %c0_24], %48 {strides = array<i32>} : memref<8x1xf32, #tpu.memory_space<vmem>>, vector<8x1xf32>,
      %cst_25 = arith.constant 0.000000e+00 : f32
      %50 = vector.broadcast %cst_25 : f32 to vector<8x1xf32>
      %c0_26 = arith.constant 0 : index
      %c0_27 = arith.constant 0 : index
      %51 = vector.load %arg7[%c0_26, %c0_27] : memref<8x1xf32, #tpu.memory_space<vmem>>, vector<8x1xf32>
      tpu.vector_store %arg7[%c0_26, %c0_27], %50 {strides = array<i32>} : memref<8x1xf32, #tpu.memory_space<vmem>>, vector<8x1xf32>,
      %cst_28 = arith.constant 0.000000e+00 : f32
      %52 = vector.broadcast %cst_28 : f32 to vector<8x1xf32>
      %c0_29 = arith.constant 0 : index
      %c0_30 = arith.constant 0 : index
      %53 = vector.load %arg8[%c0_29, %c0_30] : memref<8x1xf32, #tpu.memory_space<vmem>>, vector<8x1xf32>
      tpu.vector_store %arg8[%c0_29, %c0_30], %52 {strides = array<i32>} : memref<8x1xf32, #tpu.memory_space<vmem>>, vector<8x1xf32>,
    } else {
    }
    %c0 = arith.constant 0 : index
    %c0_1 = arith.constant 0 : index
    %3 = vector.load %arg3[%c0, %c0_1] : memref<8x32xf32, #tpu.memory_space<vmem>>, vector<8x32xf32>
    %c0_2 = arith.constant 0 : index
    %c0_3 = arith.constant 0 : index
    %4 = vector.load %arg4[%c0_2, %c0_3] : memref<8x32xf32, #tpu.memory_space<vmem>>, vector<8x32xf32>
    %cst = arith.constant dense<0.000000e+00> : vector<8x8xf32>
    %5 = tpu.matmul %3, %4, %cst {dimension_numbers = #tpu.dot_dimension_numbers<[1], [1], [0], [0], [0, 0, 1, 0], [], []>} : vector<8x32xf32>, vector<8x32xf32>, vector<8x8xf32> -> vector<8x8xf32>
    %c0_4 = arith.constant 0 : index
    %6 = memref.load %arg2[%c0_4] : memref<1xf32, #tpu.memory_space<smem>>
    %7 = vector.broadcast %6 : f32 to vector<8x8xf32>
    %8 = arith.mulf %5, %7 : vector<8x8xf32>
    %9 = tpu.iota {dimensions = array<i32: 0>} : vector<8x1xi32>
    %c8_i32 = arith.constant 8 : i32
    %10 = arith.muli %arg0, %c8_i32 : i32
    %11 = vector.broadcast %10 : i32 to vector<8x1xi32>
    %12 = arith.addi %9, %11 : vector<8x1xi32>
    %13 = tpu.iota {dimensions = array<i32: 1>} : vector<1x8xi32>
    %c8_i32_5 = arith.constant 8 : i32
    %14 = arith.muli %arg1, %c8_i32_5 : i32
    %15 = vector.broadcast %14 : i32 to vector<1x8xi32>
    %16 = arith.addi %13, %15 : vector<1x8xi32>
    %c8_i32_6 = arith.constant 8 : i32
    %17 = vector.broadcast %c8_i32_6 : i32 to vector<8x1xi32>
    %18 = arith.cmpi slt, %12, %17 : vector<8x1xi32>
    %c8_i32_7 = arith.constant 8 : i32
    %19 = vector.broadcast %c8_i32_7 : i32 to vector<1x8xi32>
    %20 = arith.cmpi slt, %16, %19 : vector<1x8xi32>
    %21 = vector.broadcast %18 : vector<8x1xi1> to vector<8x8xi1>
    %22 = vector.broadcast %20 : vector<1x8xi1> to vector<8x8xi1>
    %23 = arith.andi %21, %22 : vector<8x8xi1>
    %cst_8 = arith.constant -1.000000e+30 : f32
    %24 = vector.broadcast %cst_8 : f32 to vector<8x8xf32>
    %25 = arith.select %23, %8, %24 : vector<8x8xi1>, vector<8x8xf32>
    %26 = arith.cmpi eq, %arg0, %arg1 : i32
    %27 = arith.extui %26 : i1 to i32
    %c0_i32_9 = arith.constant 0 : i32
    %28 = arith.cmpi ne, %27, %c0_i32_9 : i32
    scf.if %28 {
      %c0_22 = arith.constant 0 : index
      %c0_23 = arith.constant 0 : index
      %48 = vector.load %arg8[%c0_22, %c0_23] : memref<8x1xf32, #tpu.memory_space<vmem>>, vector<8x1xf32>
      %49 = vector.broadcast %12 : vector<8x1xi32> to vector<8x8xi32>
      %50 = vector.broadcast %16 : vector<1x8xi32> to vector<8x8xi32>
      %51 = arith.cmpi eq, %49, %50 : vector<8x8xi32>
      %cst_24 = arith.constant 0.000000e+00 : f32
      %52 = vector.broadcast %cst_24 : f32 to vector<8x8xf32>
      %53 = arith.select %51, %25, %52 : vector<8x8xi1>, vector<8x8xf32>
      %cst_25 = arith.constant dense<0.000000e+00> : vector<8xf32>
      %54 = vector.multi_reduction <add>, %53, %cst_25 [1] : vector<8x8xf32> to vector<8xf32>
      %55 = vector.shape_cast %54 : vector<8xf32> to vector<8x1xf32>
      %56 = arith.addf %48, %55 : vector<8x1xf32>
      %c0_26 = arith.constant 0 : index
      %c0_27 = arith.constant 0 : index
      %57 = vector.load %arg8[%c0_26, %c0_27] : memref<8x1xf32, #tpu.memory_space<vmem>>, vector<8x1xf32>
      tpu.vector_store %arg8[%c0_26, %c0_27], %56 {strides = array<i32>} : memref<8x1xf32, #tpu.memory_space<vmem>>, vector<8x1xf32>,
    } else {
    }
    %c0_10 = arith.constant 0 : index
    %c0_11 = arith.constant 0 : index
    %29 = vector.load %arg6[%c0_10, %c0_11] : memref<8x1xf32, #tpu.memory_space<vmem>>, vector<8x1xf32>
    %cst_12 = arith.constant dense<0xFF800000> : vector<8xf32>
    %30 = vector.multi_reduction <maximumf>, %25, %cst_12 [1] : vector<8x8xf32> to vector<8xf32>
    %31 = vector.shape_cast %30 : vector<8xf32> to vector<8x1xf32>
    %32 = arith.maximumf %29, %31 : vector<8x1xf32>
    %c0_13 = arith.constant 0 : index
    %c0_14 = arith.constant 0 : index
    %33 = vector.load %arg7[%c0_13, %c0_14] : memref<8x1xf32, #tpu.memory_space<vmem>>, vector<8x1xf32>
    %34 = arith.subf %29, %32 : vector<8x1xf32>
    %35 = math.exp %34 : vector<8x1xf32>
    %36 = arith.mulf %33, %35 : vector<8x1xf32>
    %37 = vector.broadcast %32 : vector<8x1xf32> to vector<8x8xf32>
    %38 = arith.subf %25, %37 : vector<8x8xf32>
    %39 = math.exp %38 : vector<8x8xf32>
    %cst_15 = arith.constant dense<0.000000e+00> : vector<8xf32>
    %40 = vector.multi_reduction <add>, %39, %cst_15 [1] : vector<8x8xf32> to vector<8xf32>
    %41 = vector.shape_cast %40 : vector<8xf32> to vector<8x1xf32>
    %42 = arith.addf %36, %41 : vector<8x1xf32>
    %c0_16 = arith.constant 0 : index
    %c0_17 = arith.constant 0 : index
    %43 = vector.load %arg7[%c0_16, %c0_17] : memref<8x1xf32, #tpu.memory_space<vmem>>, vector<8x1xf32>
    tpu.vector_store %arg7[%c0_16, %c0_17], %42 {strides = array<i32>} : memref<8x1xf32, #tpu.memory_space<vmem>>, vector<8x1xf32>,
    %c0_18 = arith.constant 0 : index
    %c0_19 = arith.constant 0 : index
    %44 = vector.load %arg6[%c0_18, %c0_19] : memref<8x1xf32, #tpu.memory_space<vmem>>, vector<8x1xf32>
    tpu.vector_store %arg6[%c0_18, %c0_19], %32 {strides = array<i32>} : memref<8x1xf32, #tpu.memory_space<vmem>>, vector<8x1xf32>,
    %c0_i32_20 = arith.constant 0 : i32
    %45 = arith.cmpi eq, %arg1, %c0_i32_20 : i32
    %46 = arith.extui %45 : i1 to i32
    %c0_i32_21 = arith.constant 0 : i32
    %47 = arith.cmpi ne, %46, %c0_i32_21 : i32
    scf.if %47 {
      %c0_22 = arith.constant 0 : index
      %c0_23 = arith.constant 0 : index
      %48 = vector.load %arg6[%c0_22, %c0_23] : memref<8x1xf32, #tpu.memory_space<vmem>>, vector<8x1xf32>
      %c0_24 = arith.constant 0 : index
      %c0_25 = arith.constant 0 : index
      %49 = vector.load %arg7[%c0_24, %c0_25] : memref<8x1xf32, #tpu.memory_space<vmem>>, vector<8x1xf32>
      %50 = math.log %49 : vector<8x1xf32>
      %51 = arith.addf %48, %50 : vector<8x1xf32>
      %c0_26 = arith.constant 0 : index
      %c0_27 = arith.constant 0 : index
      %52 = vector.load %arg8[%c0_26, %c0_27] : memref<8x1xf32, #tpu.memory_space<vmem>>, vector<8x1xf32>
      %53 = arith.subf %51, %52 : vector<8x1xf32>
      %cst_28 = arith.constant 0.000000e+00 : f32
      %54 = vector.broadcast %cst_28 : f32 to vector<8x1xf32>
      %55 = arith.select %18, %53, %54 : vector<8x1xi1>, vector<8x1xf32>
      %56 = vector.shape_cast %55 : vector<8x1xf32> to vector<1x8x1xf32>
      %cst_29 = arith.constant dense<0.000000e+00> : vector<1xf32>
      %57 = vector.multi_reduction <add>, %56, %cst_29 [1, 2] : vector<1x8x1xf32> to vector<1xf32>
      %58 = vector.shape_cast %57 : vector<1xf32> to vector<1x1x1xf32>
      %59 = vector.extract %58[0, 0, 0] : f32 from vector<1x1x1xf32>
      %60 = tpu.iota {dimensions = array<i32: 1>} : vector<1x8x128xi32>
      %61 = tpu.iota {dimensions = array<i32: 2>} : vector<1x8x128xi32>
      %c0_i32_30 = arith.constant 0 : i32
      %62 = vector.broadcast %c0_i32_30 : i32 to vector<1x8x128xi32>
      %63 = arith.cmpi eq, %60, %62 : vector<1x8x128xi32>
      %c0_i32_31 = arith.constant 0 : i32
      %64 = vector.broadcast %c0_i32_31 : i32 to vector<1x8x128xi32>
      %65 = arith.cmpi eq, %61, %64 : vector<1x8x128xi32>
      %66 = arith.andi %63, %65 : vector<1x8x128xi1>
      %cst_32 = arith.constant 0.000000e+00 : f32
      %67 = vector.broadcast %59 : f32 to vector<1x8x128xf32>
      %68 = vector.broadcast %cst_32 : f32 to vector<1x8x128xf32>
      %69 = arith.select %66, %67, %68 : vector<1x8x128xi1>, vector<1x8x128xf32>
      %c0_33 = arith.constant 0 : index
      %c0_34 = arith.constant 0 : index
      %c0_35 = arith.constant 0 : index
      %70 = vector.load %arg5[%c0_33, %c0_34, %c0_35] : memref<1x8x128xf32, #tpu.memory_space<vmem>>, vector<1x8x128xf32>
      tpu.vector_store %arg5[%c0_33, %c0_34, %c0_35], %69 {strides = array<i32>} : memref<1x8x128xf32, #tpu.memory_space<vmem>>, vector<1x8x128xf32>,
    } else {
    }
    return
  }
  func.func @transform_0(%arg0: i32, %arg1: i32) -> i32 {
    %c0_i32 = arith.constant 0 : i32
    %c0_i32_0 = arith.constant 0 : i32
    return %c0_i32 : i32
  }
  func.func @transform_1(%arg0: i32, %arg1: i32) -> (i32, i32) {
    %c0_i32 = arith.constant 0 : i32
    %c0_i32_0 = arith.constant 0 : i32
    return %arg0, %c0_i32 : i32, i32
  }
  func.func @transform_2(%arg0: i32, %arg1: i32) -> (i32, i32) {
    %c0_i32 = arith.constant 0 : i32
    %c0_i32_0 = arith.constant 0 : i32
    return %arg1, %c0_i32 : i32, i32
  }
  func.func @transform_3(%arg0: i32, %arg1: i32) -> (i32, i32, i32) {
    %c0_i32 = arith.constant 0 : i32
    %c0_i32_0 = arith.constant 0 : i32
    %c0_i32_1 = arith.constant 0 : i32
    return %arg0, %c0_i32, %c0_i32_0 : i32, i32, i32
  }
}

</mosaic_0001>

<bundles_post_ra>
// kernel: tpu_custom_call.1
= control target key start
LH: loop header
LB: loop body
LE: loop exit
PB: predicated region body
PF: predicated region fallthrough
CT: control target
= control target key end

     0   :  { %9 = vsyncpa [#allocation7], 0  ;;  %s335_s0 = inlined_call_operand.<no memory space> [shape: f32[1], index: 0, kind: input, shape index: {}]   ;;  %s336_s1 = inlined_call_operand.hbm [shape: f32[8,32], index: 1, kind: input, shape index: {}]   ;;  %s337_s2 = inlined_call_operand.hbm [shape: f32[8,32], index: 2, kind: input, shape index: {}]   ;;  %s338_s3 = inlined_call_operand.hbm [shape: f32[1,8,128], index: 3, kind: output, shape index: {}]  }
   0x1   :  { %10 = vsyncpa [#allocation10], 0 }
   0x2   :  { %11 = vsyncpa [#allocation8], 0  ;;  %s19_s14 = sshll.u32 %s336_s1, 4  ;;  %s282_s15 = smov [#allocation6]   ;;  %s20_s14 = int_to_ptr.hbm [resolvable:$true] %s19_s14 }
   0x3   :  { %s21_s16 = sshll.u32 %s282_s15, 4  ;;  %s30_s19 = sshll.u32 %s337_s2, 4  ;;  %s22_s16 = int_to_ptr.vmem [resolvable:$true] %s21_s16  ;;  %s31_s19 = int_to_ptr.hbm [resolvable:$true] %s30_s19 }
   0x4   :  { %24 = dma.hbm_to_vmem [thread:$0]  %s20_s14, 128, %s22_s16, [#allocation7]  }
   0x5   :  { %s283_s20 = smov [#allocation9]  }
   0x6   :  { %s32_s21 = sshll.u32 %s283_s20, 4  ;;  %s33_s21 = int_to_ptr.vmem [resolvable:$true] %s32_s21 }
   0x7   :  { %35 = dma.hbm_to_vmem [thread:$0]  %s31_s19, 128, %s33_s21, [#allocation10]  }
   0x8   :  { %276 = dma.done.wait [#allocation7], 128  }
   0x9   :  { %277 = vsyncadd [#allocation7], 4294967168 }
   0xa   :  { %278 = dma.done.wait [#allocation10], 128  }
   0xb   :  { %279 = vsyncadd [#allocation10], 4294967168  ;;  %vm54_vm0 = vcmask 261120   ;;  %v53_v0 = vld [vmem:[#allocation9] sm:$0xff]  ;;  %v52_v1 = vld [vmem:[#allocation6] sm:$0xff]  ;;  %vm48_vm1 = vcmask 7168   ;;  %v84_v3 = vlaneseq  ;;  %v82_v5 = vstv %s335_s0 }
   0xc   :  { %187 = vmatpush.xpose.msk.msra.mxu0 %vm54_vm0, %v53_v0  ;;  %v284_v2 = vmov -inf   ;;  %vm109_vm3 = vcmask 64512   ;;  %v285_v10 = vmov 0   ;;  %v286_v11 = vmov 0.0   ;;  %s287_s0 = smov [#allocation11]   ;;  %s176_s25 = sshll.u32 %s338_s3, 4  ;;  %s177_s25 = int_to_ptr.hbm [resolvable:$true] %s176_s25 }
   0xd   :  { %49 = vst.msk [vmem:[#allocation2] sm:$0xff] %vm48_vm1, %v284_v2  ;;  %v315_v4 = vand.u32 127, %v84_v3  ;;  %197 = vset.pattern.permute.xlu0 %v285_v10  ;;  %v85_v19 = vshrl.u32 %v84_v3, 7  ;;  %s174_s22 = sshll.u32 %s287_s0, 4  ;;  %s175_s22 = int_to_ptr.vmem [resolvable:$true] %s174_s22 }
   0xe   :  { %50 = vst.msk [vmem:[#allocation3] sm:$0xff] %vm48_vm1, %v286_v11 }
   0xf   :  { %188 = vmatmul.msk.f32.vlgmr.msra.gmra.mxu0 %vm54_vm0, %v52_v1  ;;  %vm95_vm2 = vcmp.lt.s32.totalorder %v315_v4, 8  ;;  %51 = vst.msk [vmem:[#allocation4] sm:$0xff] %vm48_vm1, %v286_v11  ;;  %vm107_vm4 = vcmp.eq.s32.totalorder %v85_v19, %v315_v4  ;;  %vm163_vm5 = vcmp.eq.s32.totalorder %v85_v19, 0  ;;  %vm164_vm6 = vcmp.eq.s32.totalorder %v315_v4, 0 }
  0x10   :  { %vm165_vm7 = vmand %vm163_vm5, %vm164_vm6 }
  0x14   :  { %v116_v12 = vld [vmem:[#allocation2] sm:$0xff] }
  0x15   :  { %v122_v26 = vld [vmem:[#allocation3] sm:$0xff] }
  0x16   :  { %v106_v30 = vld [vmem:[#allocation4] sm:$0xff] }
  0x8c   :  { %v78_v6 = vpop.f32.mrf.mxu0 }
  0x8d   :  { %v83_v7 = vmul.f32 %v82_v5, %v78_v6 }
  0x8f   :  { %v101_v8 = vsel %vm95_vm2, %v83_v7, -1e+30 }
  0x90   :  { %v118_v9 = vsel %vm109_vm3, %v101_v8, -inf  ;;  %v108_v22 = vsel %vm107_vm4, %v101_v8, 0.0 }
  0x91   :  { %119 = vmax.xlane.f32.xlu0 %v118_v9  ;;  %v110_v23 = vsel %vm109_vm3, %v108_v22, 0.0 }
 0x104   :  { %v120_v13 = vpop.xlane.xlu0 %119 }
 0x105   :  { %v121_v14 = vmax.f32 %v116_v12, %v120_v13 }
 0x107   :  { %v123_v15 = vsub.f32 %v116_v12, %v121_v14  ;;  %141 = vst.msk [vmem:[#allocation2] sm:$0xff] %vm48_vm1, %v121_v14  ;;  %129 = vperm.xlu0 %197, %v121_v14  }
 0x109   :  { %v124_v24 = vmul.f32 1.442695, %v123_v15 }
 0x10e   :  { %v145_v36 = vld [vmem:[#allocation2] sm:$0xff] }
 0x179   :  { %v130_v16 = vpop.permute.xlu0 %129 }
 0x17a   :  { %v132_v17 = vsub.f32 %v101_v8, %v130_v16 }
 0x17c   :  { %v133_v18 = vmul.f32 1.442695, %v132_v17 }
 0x17e   :  { %198 = vpow2.f32 %v133_v18 }
 0x17f   :  { %200 = vpow2.f32 %v124_v24 }
 0x184   :  { %v199_v20 = vpop.eup %198 }
 0x185   :  { %v135_v21 = vsel %vm109_vm3, %v199_v20, 0.0  ;;  %v201_v25 = vpop.eup %200 }
 0x186   :  { %136 = vadd.xlane.f32.xlu1 %v135_v21  ;;  %v126_v27 = vmul.f32 %v201_v25, %v122_v26 }
 0x18e   :  { %111 = vadd.xlane.f32.xlu1 %v110_v23 }
 0x1f9   :  { %v137_v28 = vpop.xlane.xlu1 %136 }
 0x1fa   :  { %v138_v29 = vadd.f32 %v137_v28, %v126_v27 }
 0x1fc   :  { %140 = vst.msk [vmem:[#allocation3] sm:$0xff] %vm48_vm1, %v138_v29 }
 0x201   :  { %v112_v31 = vpop.xlane.xlu1 %111 }
 0x202   :  { %v113_v32 = vadd.f32 %v112_v31, %v106_v30 }
 0x203   :  { %v146_v33 = vld [vmem:[#allocation3] sm:$0xff] }
 0x204   :  { %115 = vst.msk [vmem:[#allocation4] sm:$0xff] %vm48_vm1, %v113_v32  ;;  %202 = vlog2.f32 %v146_v33 }
 0x20a   :  { %v203_v34 = vpop.eup %202 }
 0x20b   :  { %v148_v35 = vmul.f32 0.6931472, %v203_v34  ;;  %v150_v38 = vld [vmem:[#allocation4] sm:$0xff] }
 0x20d   :  { %v149_v37 = vadd.f32 %v148_v35, %v145_v36 }
 0x20f   :  { %v151_v39 = vsub.f32 %v149_v37, %v150_v38 }
 0x211   :  { %v153_v40 = vsel %vm48_vm1, %v151_v39, 0.0 }
 0x212   :  { %154 = vadd.xlane.f32.xlu2 %v153_v40 }
 0x285   :  { %v155_v41 = vpop.xlane.xlu2 %154 }
 0x286   :  { %v156_v42 = vrot.slane %v155_v41, 4 }
 0x288   :  { %v157_v43 = vadd.f32 %v156_v42, %v155_v41 }
 0x28a   :  { %v158_v44 = vrot.slane %v157_v43, 2 }
 0x28c   :  { %v159_v45 = vadd.f32 %v158_v44, %v157_v43 }
 0x28e   :  { %v160_v46 = vrot.slane %v159_v45, 1 }
 0x290   :  { %v161_v47 = vadd.f32 %v160_v46, %v159_v45 }
 0x292   :  { %189 = vpush %v161_v47 }
 0x2c3   :  { %s190_s26 = spop %189 }
 0x2c4   :  { %v166_v48 = vstv %s190_s26 }
 0x2c5   :  { %v167_v49 = vsel %vm165_vm7, %v166_v48, 0.0 }
 0x2c6   :  { %168 = vst [vmem:[#allocation11] sm:$0xff] %v167_v49 }
 0x2c7   :  { %179 = dma.vmem_to_hbm [thread:$0]  %s175_s22, 128, %s177_s25, [#allocation8]  }
 0x2c8   :  { %280 = dma.done.wait [#allocation8], 128  }
 0x2c9   :  { %281 = vsyncadd [#allocation8], 4294967168 }
 0x2ca   :  { %184 = vsyncpa [#allocation7], 1 }
 0x2cb   :  { %185 = vsyncpa [#allocation10], 1 }
 0x2cc   :  { %186 = vsyncpa [#allocation8], 1 }

</bundles_post_ra>
